<compile_context>
chip_gen: v5e
topology: v5e:2x2
jax: 0.10.0
libtpu: 0.0.40
codegen_flags: <defaults>
</compile_context>

<pallas_src>
import functools

import jax
import jax.numpy as jnp
from jax import lax
from jax.experimental import pallas as pl
from jax.experimental.pallas import tpu as pltpu

EPS = 1e-5                       # PyTorch BatchNorm1d default
NUM_CORES = 2                    # v7x megacore split for pass 1; harmless on 1-TC chips
CHUNK_DEFAULT = 256              # rows per in-kernel chunk (bounds f32 vreg pressure)
VMEM_LIMIT = 32 * 1024 * 1024    # scoped-VMEM cap; actual usage ~6 MiB at default tiles


def _round_up(x, m):
    return ((x + m - 1) // m) * m


def _pick_tile(m_rows, tm_req, chunk, min_grid=1):
    """Largest row tile <= tm_req that is a multiple of `chunk` (or a single tile
    rounded up to the f32 sublane multiple of 8 for small M), keeping >= min_grid tiles."""
    if m_rows <= chunk:
        return _round_up(m_rows, 8)
    tm = min(tm_req, _round_up(m_rows, chunk))
    tm = max(chunk, (tm // chunk) * chunk)
    if min_grid > 1 and pl.cdiv(m_rows, tm) < min_grid:
        tm = max(chunk, _round_up(pl.cdiv(m_rows, min_grid), chunk))
    return tm


# ---------------- Pass 1: per-channel sum / sum-of-squares of y = x @ W --------------------
def _stats_kernel(x_ref, w_ref, sum_ref, sumsq_ref, *, tm, chunk, m_rows,
                  tiles_per_core, need_mask):
    c = pl.program_id(0)          # core axis ("parallel")
    j = pl.program_id(1)          # per-core tile axis ("arbitrary", accumulates)

    @pl.when(j == 0)
    def _():
        sum_ref[...] = jnp.zeros_like(sum_ref)
        sumsq_ref[...] = jnp.zeros_like(sumsq_ref)

    w = w_ref[...]                                   # (C, O) bf16, VMEM resident
    out_ch = w_ref.shape[1]
    tile_row0 = (c * tiles_per_core + j) * tm        # logical first row of this tile

    def body(k, carry):
        s, ss = carry
        start = pl.multiple_of(k * chunk, chunk)
        xc = x_ref[pl.ds(start, chunk), :]           # (chunk, C) f32
        if need_mask:
            # Zero rows past the true M (tile-tail padding / fully-overflowed core tiles);
            # zero rows contribute exactly 0 to both sums.
            valid = m_rows - (tile_row0 + start)
            rid = lax.broadcasted_iota(jnp.int32, (chunk, 1), 0)
            xc = jnp.where(rid < valid, xc, 0.0)
        y = jnp.dot(xc.astype(jnp.bfloat16), w, preferred_element_type=jnp.float32)
        s = s + jnp.sum(y, axis=0, keepdims=True)
        ss = ss + jnp.sum(y * y, axis=0, keepdims=True)
        return s, ss

    zero = jnp.zeros((1, out_ch), jnp.float32)
    s, ss = lax.fori_loop(0, tm // chunk, body, (zero, zero), unroll=True)
    # Row 0 of the per-core (8, O) slab carries the partials; rows 1..7 stay zero.
    sum_ref[0:1, :] += s
    sumsq_ref[0:1, :] += ss


# ---------------- Pass 2: out = (x @ W) * scale + shift ------------------------------------
def _normalize_kernel(x_ref, w_ref, scale_ref, shift_ref, o_ref, *, tm, chunk):
    w = w_ref[...]                # (C, O) bf16
    scale = scale_ref[...]        # (1, O) f32
    shift = shift_ref[...]        # (1, O) f32

    def body(k, carry):
        start = pl.multiple_of(k * chunk, chunk)
        xc = x_ref[pl.ds(start, chunk), :]
        y = jnp.dot(xc.astype(jnp.bfloat16), w, preferred_element_type=jnp.float32)
        o_ref[pl.ds(start, chunk), :] = y * scale + shift
        return carry

    lax.fori_loop(0, tm // chunk, body, 0, unroll=True)


@functools.partial(jax.jit, static_argnames=("tm_stats", "tm_norm", "chunk"))
def batch_norm_linear(points, weight, bias, gamma, beta, *,
                      tm_stats=4096, tm_norm=2048, chunk=CHUNK_DEFAULT):
    """points: (B, N, C) f32; weight: (O, C) [PyTorch layout]; bias/gamma/beta: (O,)."""
    del bias  # cancels exactly under training-mode (batch-stats) BN mean subtraction.

    B, N, C = points.shape
    O = weight.shape[0]
    M = B * N

    x = points.reshape(M, C)                     # free reshape; x stays f32 in HBM
    w_t = weight.T.astype(jnp.bfloat16)          # (C, O), tiny

    # -------- Pass 1: batch statistics (per-core partial sums over row tiles) --------------
    tm1 = _pick_tile(M, tm_stats, chunk, min_grid=NUM_CORES)
    chunk1 = min(chunk, tm1)
    n_tiles = pl.cdiv(M, tm1)
    tiles_per_core = pl.cdiv(n_tiles, NUM_CORES)
    need_mask = tiles_per_core * NUM_CORES * tm1 != M

    def x_map_stats(c, j):
        # Clamp so the DMA window start always stays inside x; overflowed (c, j) tiles are
        # fully masked in-kernel and contribute zero.
        return (jnp.minimum(c * tiles_per_core + j, n_tiles - 1), 0)

    s_arr, ss_arr = pl.pallas_call(
        functools.partial(_stats_kernel, tm=tm1, chunk=chunk1, m_rows=M,
                          tiles_per_core=tiles_per_core, need_mask=need_mask),
        out_shape=(jax.ShapeDtypeStruct((NUM_CORES * 8, O), jnp.float32),
                   jax.ShapeDtypeStruct((NUM_CORES * 8, O), jnp.float32)),
        grid=(NUM_CORES, tiles_per_core),
        in_specs=[
            pl.BlockSpec((tm1, C), x_map_stats),
            pl.BlockSpec((C, O), lambda c, j: (0, 0)),
        ],
        out_specs=(
            pl.BlockSpec((8, O), lambda c, j: (c, 0)),
            pl.BlockSpec((8, O), lambda c, j: (c, 0)),
        ),
        compiler_params=pltpu.CompilerParams(
            dimension_semantics=("parallel", "arbitrary"),
            vmem_limit_bytes=VMEM_LIMIT,
        ),
    )(x, w_t)

    # Tiny (O,)-sized statistics / folded-affine math (rows 1..7 of each slab are zero).
    s = jnp.sum(s_arr, axis=0)
    ss = jnp.sum(ss_arr, axis=0)
    mean = s * (1.0 / M)
    var = jnp.maximum(ss * (1.0 / M) - mean * mean, 0.0)
    inv_std = lax.rsqrt(var + EPS)
    g = gamma.astype(jnp.float32)
    scale_v = g * inv_std                        # (O,)
    shift_v = beta.astype(jnp.float32) - mean * scale_v
    scale = scale_v.reshape(1, O)
    shift = shift_v.reshape(1, O)

    # -------- Pass 2: normalize (embarrassingly parallel over row tiles) -------------------
    tm2 = _pick_tile(M, tm_norm, chunk, min_grid=2)   # grid>=2 keeps v7x megacore sharding
    chunk2 = min(chunk, tm2)
    grid2 = pl.cdiv(M, tm2)
    m_out = grid2 * tm2      # rows padded only up to a tile multiple; sliced iff needed

    out = pl.pallas_call(
        functools.partial(_normalize_kernel, tm=tm2, chunk=chunk2),
        out_shape=jax.ShapeDtypeStruct((m_out, O), jnp.float32),
        grid=(grid2,),
        in_specs=[
            pl.BlockSpec((tm2, C), lambda i: (i, 0)),
            pl.BlockSpec((C, O), lambda i: (0, 0)),
            pl.BlockSpec((1, O), lambda i: (0, 0)),
            pl.BlockSpec((1, O), lambda i: (0, 0)),
        ],
        out_specs=pl.BlockSpec((tm2, O), lambda i: (i, 0)),
        compiler_params=pltpu.CompilerParams(
            dimension_semantics=("parallel",),
            vmem_limit_bytes=VMEM_LIMIT,
        ),
    )(x, w_t, scale, shift)

    if m_out != M:
        out = out[:M]
    return out.reshape(B, N, O)


# ---------------------------------- references ---------------------------------------------
def reference_f32(points, weight, bias, gamma, beta):
    B, N, C = points.shape
    O = weight.shape[0]
    x = points.reshape(B * N, C)
    y = x @ weight.T + bias
    mean = jnp.mean(y, axis=0, keepdims=True)
    var = jnp.mean((y - mean) ** 2, axis=0, keepdims=True)
    out = (y - mean) / jnp.sqrt(var + EPS) * gamma + beta
    return out.reshape(B, N, O)


def reference_bf16_inputs(points, weight, bias, gamma, beta):
    # Same math with the kernel's bf16-rounded matmul operands (f32 accumulation),
    # isolating kernel correctness from the bf16 operand-cast precision choice.
    B, N, C = points.shape
    O = weight.shape[0]
    x = points.reshape(B * N, C).astype(jnp.bfloat16).astype(jnp.float32)
    w = weight.astype(jnp.bfloat16).astype(jnp.float32)
    y = x @ w.T + bias
    mean = jnp.mean(y, axis=0, keepdims=True)
    var = jnp.mean((y - mean) ** 2, axis=0, keepdims=True)
    out = (y - mean) / jnp.sqrt(var + EPS) * gamma + beta
    return out.reshape(B, N, O)


def _check(out, points, weight, bias, gamma, beta, tag):
    ref_bf16 = reference_bf16_inputs(points, weight, bias, gamma, beta)
    assert jnp.allclose(out, ref_bf16, atol=3e-4, rtol=3e-4), f"{tag}: kernel math mismatch"
    ref = reference_f32(points, weight, bias, gamma, beta)
    assert jnp.allclose(out, ref, atol=3e-2, rtol=3e-2), f"{tag}: mismatch vs f32 reference"


if __name__ == "__main__":
    C, O = 32, 64

    key = jax.random.PRNGKey(0)
    k_pts, k_pts2, k_w, k_b, k_g, k_be = jax.random.split(key, 6)

    bound = 1.0 / (C ** 0.5)
    weight = jax.random.uniform(k_w, (O, C), minval=-bound, maxval=bound, dtype=jnp.float32)
    bias = jax.random.uniform(k_b, (O,), minval=-bound, maxval=bound, dtype=jnp.float32)
    gamma = 1.0 + 0.1 * jax.random.normal(k_g, (O,), dtype=jnp.float32)
    beta = 0.1 * jax.random.normal(k_be, (O,), dtype=jnp.float32)

    # --- Test 1: M divisible by the tiles; exercises multi-tile per-core accumulation and
    #             the multi-chunk inner loop (tm=32, chunk=16 -> 2 chunks/tile). -------------
    B1, N1 = 2, 64
    pts1 = jax.random.normal(k_pts, (B1, N1, C), dtype=jnp.float32)
    out1 = batch_norm_linear(pts1, weight, bias, gamma, beta,
                             tm_stats=32, tm_norm=32, chunk=16)
    out1 = jax.block_until_ready(out1)
    assert out1.shape == (B1, N1, O)
    _check(out1, pts1, weight, bias, gamma, beta, "test1")

    # --- Test 2: M NOT divisible by the tiles; exercises the remainder-row masking in the
    #             stats kernel and the padded-rows slice on the pass-2 output. ---------------
    B2, N2 = 2, 53
    pts2 = jax.random.normal(k_pts2, (B2, N2, C), dtype=jnp.float32)
    out2 = batch_norm_linear(pts2, weight, bias, gamma, beta,
                             tm_stats=32, tm_norm=32, chunk=16)
    out2 = jax.block_until_ready(out2)
    assert out2.shape == (B2, N2, O)
    _check(out2, pts2, weight, bias, gamma, beta, "test2")

    # --- Test 3: default (large) tiles; exercises the single-tile path where the second
    #             stats "core" has no work and is fully masked out. --------------------------
    out3 = batch_norm_linear(pts1, weight, bias, gamma, beta)
    out3 = jax.block_until_ready(out3)
    assert out3.shape == (B1, N1, O)
    _check(out3, pts1, weight, bias, gamma, beta, "test3")

    print("KERNEL_OK")
</pallas_src>

<mosaic_0001>
module attributes {stable_mosaic.version = 11 : i64} {
  func.func @_stats_kernel(%arg0: i32, %arg1: i32, %arg2: memref<32x32xf32, #tpu.memory_space<vmem>>, %arg3: memref<32x64xbf16, #tpu.memory_space<vmem>>, %arg4: memref<8x64xf32, #tpu.memory_space<vmem>>, %arg5: memref<8x64xf32, #tpu.memory_space<vmem>>) attributes {dimension_semantics = [#tpu.dimension_semantics<parallel>, #tpu.dimension_semantics<arbitrary>], iteration_bounds = array<i64: 2, 2>, scalar_prefetch = 0 : i64, scratch_operands = 0 : i64, tpu.core_type = #tpu.core_type<tc>, window_params = [{transform_indices = @transform_0, window_bounds = array<i64: 32, 32>}, {pipeline_mode = #tpu.pipeline_mode<synchronous>, transform_indices = @transform_1, window_bounds = array<i64: 32, 64>}, {transform_indices = @transform_2, window_bounds = array<i64: 8, 64>}, {transform_indices = @transform_3, window_bounds = array<i64: 8, 64>}]} {
    %c0_i32 = arith.constant 0 : i32
    %0 = arith.cmpi eq, %arg1, %c0_i32 : i32
    %1 = arith.extui %0 : i1 to i32
    %c0_i32_0 = arith.constant 0 : i32
    %2 = arith.cmpi ne, %1, %c0_i32_0 : i32
    scf.if %2 {
      %cst_20 = arith.constant 0.000000e+00 : f32
      %37 = vector.broadcast %cst_20 : f32 to vector<8x64xf32>
      %c0_21 = arith.constant 0 : index
      %c0_22 = arith.constant 0 : index
      %38 = vector.load %arg4[%c0_21, %c0_22] : memref<8x64xf32, #tpu.memory_space<vmem>>, vector<8x64xf32>
      tpu.vector_store %arg4[%c0_21, %c0_22], %37 {strides = array<i32>} : memref<8x64xf32, #tpu.memory_space<vmem>>, vector<8x64xf32>,
      %cst_23 = arith.constant 0.000000e+00 : f32
      %39 = vector.broadcast %cst_23 : f32 to vector<8x64xf32>
      %c0_24 = arith.constant 0 : index
      %c0_25 = arith.constant 0 : index
      %40 = vector.load %arg5[%c0_24, %c0_25] : memref<8x64xf32, #tpu.memory_space<vmem>>, vector<8x64xf32>
      tpu.vector_store %arg5[%c0_24, %c0_25], %39 {strides = array<i32>} : memref<8x64xf32, #tpu.memory_space<vmem>>, vector<8x64xf32>,
    } else {
    }
    %c0 = arith.constant 0 : index
    %c0_1 = arith.constant 0 : index
    %3 = vector.load %arg3[%c0, %c0_1] : memref<32x64xbf16, #tpu.memory_space<vmem>>, vector<32x64xbf16>
    %cst = arith.constant 0.000000e+00 : f32
    %4 = vector.broadcast %cst : f32 to vector<1x64xf32>
    %c0_i32_2 = arith.constant 0 : i32
    %c16_i32 = arith.constant 16 : i32
    %5 = arith.muli %c0_i32_2, %c16_i32 : i32
    %6 = tpu.assume_multiple %5, 16 : i32
    %7 = arith.index_cast %6 : i32 to index
    %c0_3 = arith.constant 0 : index
    %8 = vector.load %arg2[%7, %c0_3] : memref<32x32xf32, #tpu.memory_space<vmem>>, vector<16x32xf32>
    %9 = arith.truncf %8 : vector<16x32xf32> to vector<16x32xbf16>
    %cst_4 = arith.constant dense<0.000000e+00> : vector<16x64xf32>
    %10 = tpu.matmul %9, %3, %cst_4 {dimension_numbers = #tpu.dot_dimension_numbers<[1], [0], [0], [1], [0, 0, 1, 1], [], []>} : vector<16x32xbf16>, vector<32x64xbf16>, vector<16x64xf32> -> vector<16x64xf32>
    %cst_5 = arith.constant dense<0.000000e+00> : vector<64xf32>
    %11 = vector.multi_reduction <add>, %10, %cst_5 [0] : vector<16x64xf32> to vector<64xf32>
    %12 = vector.shape_cast %11 : vector<64xf32> to vector<1x64xf32>
    %13 = arith.addf %4, %12 : vector<1x64xf32>
    %14 = arith.mulf %10, %10 : vector<16x64xf32>
    %cst_6 = arith.constant dense<0.000000e+00> : vector<64xf32>
    %15 = vector.multi_reduction <add>, %14, %cst_6 [0] : vector<16x64xf32> to vector<64xf32>
    %16 = vector.shape_cast %15 : vector<64xf32> to vector<1x64xf32>
    %17 = arith.addf %4, %16 : vector<1x64xf32>
    %c1_i32 = arith.constant 1 : i32
    %c16_i32_7 = arith.constant 16 : i32
    %18 = arith.muli %c1_i32, %c16_i32_7 : i32
    %19 = tpu.assume_multiple %18, 16 : i32
    %20 = arith.index_cast %19 : i32 to index
    %c0_8 = arith.constant 0 : index
    %21 = vector.load %arg2[%20, %c0_8] : memref<32x32xf32, #tpu.memory_space<vmem>>, vector<16x32xf32>
    %22 = arith.truncf %21 : vector<16x32xf32> to vector<16x32xbf16>
    %cst_9 = arith.constant dense<0.000000e+00> : vector<16x64xf32>
    %23 = tpu.matmul %22, %3, %cst_9 {dimension_numbers = #tpu.dot_dimension_numbers<[1], [0], [0], [1], [0, 0, 1, 1], [], []>} : vector<16x32xbf16>, vector<32x64xbf16>, vector<16x64xf32> -> vector<16x64xf32>
    %cst_10 = arith.constant dense<0.000000e+00> : vector<64xf32>
    %24 = vector.multi_reduction <add>, %23, %cst_10 [0] : vector<16x64xf32> to vector<64xf32>
    %25 = vector.shape_cast %24 : vector<64xf32> to vector<1x64xf32>
    %26 = arith.addf %13, %25 : vector<1x64xf32>
    %27 = arith.mulf %23, %23 : vector<16x64xf32>
    %cst_11 = arith.constant dense<0.000000e+00> : vector<64xf32>
    %28 = vector.multi_reduction <add>, %27, %cst_11 [0] : vector<16x64xf32> to vector<64xf32>
    %29 = vector.shape_cast %28 : vector<64xf32> to vector<1x64xf32>
    %30 = arith.addf %17, %29 : vector<1x64xf32>
    %c2_i32 = arith.constant 2 : i32
    %c0_12 = arith.constant 0 : index
    %c0_13 = arith.constant 0 : index
    %31 = vector.load %arg4[%c0_12, %c0_13] : memref<8x64xf32, #tpu.memory_space<vmem>>, vector<1x64xf32>
    %32 = arith.addf %31, %26 : vector<1x64xf32>
    %c0_14 = arith.constant 0 : index
    %c0_15 = arith.constant 0 : index
    %33 = vector.load %arg4[%c0_14, %c0_15] : memref<8x64xf32, #tpu.memory_space<vmem>>, vector<1x64xf32>
    tpu.vector_store %arg4[%c0_14, %c0_15], %32 {strides = array<i32>} : memref<8x64xf32, #tpu.memory_space<vmem>>, vector<1x64xf32>,
    %c0_16 = arith.constant 0 : index
    %c0_17 = arith.constant 0 : index
    %34 = vector.load %arg5[%c0_16, %c0_17] : memref<8x64xf32, #tpu.memory_space<vmem>>, vector<1x64xf32>
    %35 = arith.addf %34, %30 : vector<1x64xf32>
    %c0_18 = arith.constant 0 : index
    %c0_19 = arith.constant 0 : index
    %36 = vector.load %arg5[%c0_18, %c0_19] : memref<8x64xf32, #tpu.memory_space<vmem>>, vector<1x64xf32>
    tpu.vector_store %arg5[%c0_18, %c0_19], %35 {strides = array<i32>} : memref<8x64xf32, #tpu.memory_space<vmem>>, vector<1x64xf32>,
    return
  }
  func.func @transform_0(%arg0: i32, %arg1: i32) -> (i32, i32) {
    %c2_i32 = arith.constant 2 : i32
    %0 = arith.muli %arg0, %c2_i32 : i32
    %1 = arith.addi %0, %arg1 : i32
    %c3_i32 = arith.constant 3 : i32
    %2 = arith.minsi %1, %c3_i32 : i32
    %c0_i32 = arith.constant 0 : i32
    %c0_i32_0 = arith.constant 0 : i32
    return %2, %c0_i32 : i32, i32
  }
  func.func @transform_1(%arg0: i32, %arg1: i32) -> (i32, i32) {
    %c0_i32 = arith.constant 0 : i32
    %c0_i32_0 = arith.constant 0 : i32
    %c0_i32_1 = arith.constant 0 : i32
    return %c0_i32, %c0_i32_0 : i32, i32
  }
  func.func @transform_2(%arg0: i32, %arg1: i32) -> (i32, i32) {
    %c0_i32 = arith.constant 0 : i32
    %c0_i32_0 = arith.constant 0 : i32
    return %arg0, %c0_i32 : i32, i32
  }
  func.func @transform_3(%arg0: i32, %arg1: i32) -> (i32, i32) {
    %c0_i32 = arith.constant 0 : i32
    %c0_i32_0 = arith.constant 0 : i32
    return %arg0, %c0_i32 : i32, i32
  }
}

module attributes {stable_mosaic.version = 11 : i64} {
  func.func @_normalize_kernel(%arg0: i32, %arg1: memref<32x32xf32, #tpu.memory_space<vmem>>, %arg2: memref<32x64xbf16, #tpu.memory_space<vmem>>, %arg3: memref<1x64xf32, #tpu.memory_space<vmem>>, %arg4: memref<1x64xf32, #tpu.memory_space<vmem>>, %arg5: memref<32x64xf32, #tpu.memory_space<vmem>>) attributes {dimension_semantics = [#tpu.dimension_semantics<parallel>], iteration_bounds = array<i64: 4>, scalar_prefetch = 0 : i64, scratch_operands = 0 : i64, tpu.core_type = #tpu.core_type<tc>, window_params = [{transform_indices = @transform_0, window_bounds = array<i64: 32, 32>}, {pipeline_mode = #tpu.pipeline_mode<synchronous>, transform_indices = @transform_1, window_bounds = array<i64: 32, 64>}, {pipeline_mode = #tpu.pipeline_mode<synchronous>, transform_indices = @transform_2, window_bounds = array<i64: 1, 64>}, {pipeline_mode = #tpu.pipeline_mode<synchronous>, transform_indices = @transform_3, window_bounds = array<i64: 1, 64>}, {transform_indices = @transform_4, window_bounds = array<i64: 32, 64>}]} {
    %c0 = arith.constant 0 : index
    %c0_0 = arith.constant 0 : index
    %0 = vector.load %arg2[%c0, %c0_0] : memref<32x64xbf16, #tpu.memory_space<vmem>>, vector<32x64xbf16>
    %c0_1 = arith.constant 0 : index
    %c0_2 = arith.constant 0 : index
    %1 = vector.load %arg3[%c0_1, %c0_2] : memref<1x64xf32, #tpu.memory_space<vmem>>, vector<1x64xf32>
    %c0_3 = arith.constant 0 : index
    %c0_4 = arith.constant 0 : index
    %2 = vector.load %arg4[%c0_3, %c0_4] : memref<1x64xf32, #tpu.memory_space<vmem>>, vector<1x64xf32>
    %c0_i32 = arith.constant 0 : i32
    %c16_i32 = arith.constant 16 : i32
    %3 = arith.muli %c0_i32, %c16_i32 : i32
    %4 = tpu.assume_multiple %3, 16 : i32
    %5 = arith.index_cast %4 : i32 to index
    %c0_5 = arith.constant 0 : index
    %6 = vector.load %arg1[%5, %c0_5] : memref<32x32xf32, #tpu.memory_space<vmem>>, vector<16x32xf32>
    %7 = arith.truncf %6 : vector<16x32xf32> to vector<16x32xbf16>
    %cst = arith.constant dense<0.000000e+00> : vector<16x64xf32>
    %8 = tpu.matmul %7, %0, %cst {dimension_numbers = #tpu.dot_dimension_numbers<[1], [0], [0], [1], [0, 0, 1, 1], [], []>} : vector<16x32xbf16>, vector<32x64xbf16>, vector<16x64xf32> -> vector<16x64xf32>
    %9 = vector.broadcast %1 : vector<1x64xf32> to vector<16x64xf32>
    %10 = arith.mulf %8, %9 : vector<16x64xf32>
    %11 = vector.broadcast %2 : vector<1x64xf32> to vector<16x64xf32>
    %12 = arith.addf %10, %11 : vector<16x64xf32>
    %13 = arith.index_cast %4 : i32 to index
    %c0_6 = arith.constant 0 : index
    %14 = vector.load %arg5[%13, %c0_6] : memref<32x64xf32, #tpu.memory_space<vmem>>, vector<16x64xf32>
    tpu.vector_store %arg5[%13, %c0_6], %12 {strides = array<i32>} : memref<32x64xf32, #tpu.memory_space<vmem>>, vector<16x64xf32>,
    %c1_i32 = arith.constant 1 : i32
    %c16_i32_7 = arith.constant 16 : i32
    %15 = arith.muli %c1_i32, %c16_i32_7 : i32
    %16 = tpu.assume_multiple %15, 16 : i32
    %17 = arith.index_cast %16 : i32 to index
    %c0_8 = arith.constant 0 : index
    %18 = vector.load %arg1[%17, %c0_8] : memref<32x32xf32, #tpu.memory_space<vmem>>, vector<16x32xf32>
    %19 = arith.truncf %18 : vector<16x32xf32> to vector<16x32xbf16>
    %cst_9 = arith.constant dense<0.000000e+00> : vector<16x64xf32>
    %20 = tpu.matmul %19, %0, %cst_9 {dimension_numbers = #tpu.dot_dimension_numbers<[1], [0], [0], [1], [0, 0, 1, 1], [], []>} : vector<16x32xbf16>, vector<32x64xbf16>, vector<16x64xf32> -> vector<16x64xf32>
    %21 = vector.broadcast %1 : vector<1x64xf32> to vector<16x64xf32>
    %22 = arith.mulf %20, %21 : vector<16x64xf32>
    %23 = vector.broadcast %2 : vector<1x64xf32> to vector<16x64xf32>
    %24 = arith.addf %22, %23 : vector<16x64xf32>
    %25 = arith.index_cast %16 : i32 to index
    %c0_10 = arith.constant 0 : index
    %26 = vector.load %arg5[%25, %c0_10] : memref<32x64xf32, #tpu.memory_space<vmem>>, vector<16x64xf32>
    tpu.vector_store %arg5[%25, %c0_10], %24 {strides = array<i32>} : memref<32x64xf32, #tpu.memory_space<vmem>>, vector<16x64xf32>,
    %c2_i32 = arith.constant 2 : i32
    return
  }
  func.func @transform_0(%arg0: i32) -> (i32, i32) {
    %c0_i32 = arith.constant 0 : i32
    %c0_i32_0 = arith.constant 0 : i32
    return %arg0, %c0_i32 : i32, i32
  }
  func.func @transform_1(%arg0: i32) -> (i32, i32) {
    %c0_i32 = arith.constant 0 : i32
    %c0_i32_0 = arith.constant 0 : i32
    %c0_i32_1 = arith.constant 0 : i32
    return %c0_i32, %c0_i32_0 : i32, i32
  }
  func.func @transform_2(%arg0: i32) -> (i32, i32) {
    %c0_i32 = arith.constant 0 : i32
    %c0_i32_0 = arith.constant 0 : i32
    %c0_i32_1 = arith.constant 0 : i32
    return %c0_i32, %c0_i32_0 : i32, i32
  }
  func.func @transform_3(%arg0: i32) -> (i32, i32) {
    %c0_i32 = arith.constant 0 : i32
    %c0_i32_0 = arith.constant 0 : i32
    %c0_i32_1 = arith.constant 0 : i32
    return %c0_i32, %c0_i32_0 : i32, i32
  }
  func.func @transform_4(%arg0: i32) -> (i32, i32) {
    %c0_i32 = arith.constant 0 : i32
    %c0_i32_0 = arith.constant 0 : i32
    return %arg0, %c0_i32 : i32, i32
  }
}

</mosaic_0001>

<bundles_post_ra>
// kernel: batch_norm_linear.3
= control target key start
LH: loop header
LB: loop body
LE: loop exit
PB: predicated region body
PF: predicated region fallthrough
CT: control target
= control target key end

     0   :  { %9 = vsyncpa [#allocation3], 0  ;;  %s621_s0 = inlined_call_operand.vmem [shape: f32[128,32], index: 0, kind: input, shape index: {}]   ;;  %s622_s1 = inlined_call_operand.vmem [shape: bf16[32,64], index: 1, kind: input, shape index: {}]   ;;  %s623_s2 = inlined_call_operand.vmem [shape: f32[1,64], index: 2, kind: input, shape index: {}]   ;;  %s624_s3 = inlined_call_operand.vmem [shape: f32[1,64], index: 3, kind: input, shape index: {}]   ;;  %s625_s4 = inlined_call_operand.hbm [shape: f32[128,64], index: 4, kind: output, shape index: {}]  }
   0x1   :  { %11 = vsyncpa [#allocation3 + $0x1], 0  ;;  %s521_s15 = smov 0   ;;  %s523_s16 = smov 0  }
   0x2   :  { %s525_s17 = smov 0   ;;  %s527_s18 = smov 0  }
   0x3 LB: > { %s542_s19 = sadd.s32 4294967295, %s492_s18   ;;  %s358_s20 = sadd.s32 4294967294, %s492_s18   ;;  %s492_s18 = sphi %s527_s18, %s631_s18   ;;  %s488_s17 = sphi %s525_s17, %s630_s17   ;;  %s484_s16 = sphi %s523_s16, %s629_s16   ;;  %s480_s15 = sphi %s521_s15, %s628_s15  }
   0x4   : > { %s546_s21 = sadd.s32 1, %s492_s18   ;;  %s113_s22 = sadd.s32 1, %s488_s17 }
   0x5   : > { %s110_s23 = ssub.s32 %s492_s18, %s546_s21  ;;  %p123_p0 = scmp.ne.s32.totalorder %s488_s17, %s484_s16 }
   0x6   : > { %p111_p1 = scmp.eq.s32.totalorder %s110_s23, 0  ;;  %p124_p2 = scmp.eq.s32.totalorder %s542_s19, 3 }
   0x7   : > { %p129_p3 = scmp.ne.s32.totalorder %s484_s16, %s480_s15  ;;  %p130_p4 = scmp.eq.s32.totalorder %s358_s20, 3 }
   0x8   : > { %s557_s24 = scalar_select %p111_p1, %s488_s17, %s113_s22  }
   0x9   : > { %p559_p5 = por %p124_p2, %p123_p0  ;;  %p563_p6 = por %p130_p4, %p129_p3 }
   0xa   : > { %p361_p7 = scmp.ge.s32.totalorder %s492_s18, 1  ;;  %p166_p8 = scmp.lt.s32.totalorder %s492_s18, 5 }
   0xc   : > { %p167_p9 = pnand %p361_p7, %p166_p8 }
   0xd   : > { %s363_s29 = sshll.u32 (!%p167_p9), %s542_s19, 2  ;;  %s189_s10 = sand.u32 (!%p167_p9), 1, %s484_s16  }
   0xe   : > { %170 = sbr.rel (%p167_p9) target bundleno = 170 (0xaa), region = 36  ;;  %p193_p10 = scmp.lt.s32.totalorder (!%p167_p9), %s363_s29, 15 }
   0xf   : > { %s362_s13 = sshll.u32 (!%p167_p9), %s189_s10, 5  ;;  %s386_s22 = sshll.u32 (!%p167_p9), %s542_s19, 5 }
  0x10   : > { %s191_s23 = scalar_lea.vmem (!%p167_p9), [#allocation2], %s362_s13  ;;  %s281_s19 = scalar_lea.sflag (!%p167_p9), [#allocation3], %s189_s10 }
  0x11   : > { %s293_s30 = sshll.u32 (!%p167_p9), %s191_s23, 4  ;;  %s450_s11 = scalar_lea.hbm (!%p167_p9), %s625_s4, 128  ;;  %s294_s30 = int_to_ptr.vmem [resolvable:$true] %s293_s30 }
  0x13   : > { %v385_v0 = vld [vmem:[%s622_s1 + $0x8] sm:$0xff]  ;;  %v384_v1 = vld [vmem:[%s622_s1] sm:$0xff]  ;;  %s633_s29 = smov (!%p193_p10, %s363_s29), 15  ;;  %vm221_vm0 = vcmask 261120   ;;  %vm249_vm1 = vcmask 523264  }
  0x14   : > { %231 = vmatpush.bf16.msra.mxu0 %v385_v0  ;;  %265 = vmatpush.bf16.msra.mxu1 %v385_v0  ;;  %s364_s6 = sshll.u32 %s633_s29, 3  ;;  %v428_v8 = vld [vmem:[%s623_s2] ss:$0 sm:$0xff]  ;;  %s292_s29 = scalar_lea.hbm %s625_s4, %s386_s22 }
  0x15   : > { %s196_s9 = scalar_lea.vmem %s621_s0, %s364_s6  ;;  %v429_v9 = vld [vmem:[%s624_s3] ss:$0 sm:$0xff]  ;;  %s295_s5 = sshll.u32 %s292_s29, 4  ;;  %s296_s5 = int_to_ptr.hbm [resolvable:$true] %s295_s5 }
  0x16   : > { %v206_v2 = vld [vmem:[%s196_s9] sm:$0xff]  ;;  %v207_v3 = vld [vmem:[%s196_s9 + $0x8] sm:$0xff]  ;;  %v374_v4 = vld [vmem:[%s196_s9 + $0x10] sm:$0xff]  ;;  %s444_s6 = sshra.s32 %s296_s5, 4  ;;  %s445_s6 = int_to_ptr.hbm [resolvable:$true] %s444_s6 }
  0x17   : > { %v208_v5 = vpack.c.bf16 %v207_v3, %v206_v2  ;;  %v375_v6 = vld [vmem:[%s196_s9 + $0x18] sm:$0xff]  ;;  %s446_s7 = scalar_lea.hbm %s445_s6, 32  ;;  %p451_p0 = scmp.lt.s32.totalorder %s445_s6, %s625_s4 }
  0x18   : > { %232 = vmatpush.bf16.msra.mxu0 %v384_v1  ;;  %266 = vmatpush.bf16.msra.mxu1 %v384_v1  ;;  %v255_v7 = vpack.c.bf16 %v375_v6, %v374_v4  ;;  %p447_p11 = scmp.ne.s32.totalorder %s445_s6, %s446_s7  ;;  %p452_p1 = scmp.lt.s32.totalorder %s450_s11, %s446_s7 }
  0x1a   : > { %p448_p12 = pnand %p447_p11, %p559_p5  ;;  %p453_p2 = por %p452_p1, %p451_p0 }
  0x1b   : > { %373 = vmatmul.msk.bf16.vlgmr.msra.gmra.mxu0 %vm221_vm0, %v208_v5  ;;  %376 = vmatmul.msk.bf16.vlgmr.msra.gmra.mxu1 %vm221_vm0, %v255_v7 }
  0x1c   : > { %p449_p13 = pneg %p448_p12 }
  0x1e   : > { %p454_p3 = pnand %p453_p2, %p449_p13 }
  0x98   : > { %v234_v10 = vpop.f32.mrf.mxu0  ;;  %v268_v12 = vpop.f32.mrf.mxu1 }
  0x99   : > { %v242_v11 = vmul.f32 %v428_v8, %v234_v10  ;;  %v273_v13 = vmul.f32 %v428_v8, %v268_v12 }
  0x9b   : > { %v247_v14 = vadd.f32 %v429_v9, %v242_v11  ;;  %v275_v15 = vadd.f32 %v429_v9, %v273_v13 }
  0x9d   : > { %250 = vst.msk [vmem:[%s191_s23] sm:$0xff] %vm249_vm1, %v247_v14 }
  0x9e   : > { %377 = vst.msk [vmem:[%s191_s23 + $0x10] sm:$0xff] %vm249_vm1, %v275_v15 }
  0xa0   : > { %v236_v16 = vpop.f32.mrf.mxu0  ;;  %v270_v18 = vpop.f32.mrf.mxu1 }
  0xa1   : > { %v243_v17 = vmul.f32 %v428_v8, %v236_v16  ;;  %v274_v19 = vmul.f32 %v428_v8, %v270_v18 }
  0xa3   : > { %v248_v20 = vadd.f32 %v429_v9, %v243_v17  ;;  %v276_v21 = vadd.f32 %v429_v9, %v274_v19 }
  0xa5   : > { %251 = vst.msk [vmem:[%s191_s23 + $0x8] sm:$0xff] %vm249_vm1, %v248_v20 }
  0xa6   : > { %378 = vst.msk [vmem:[%s191_s23 + $0x18] sm:$0xff] %vm249_vm1, %v276_v21 }
  0xa7   : > { %457 = shalt.err (!%p454_p3)
}
  0xa8   : > { %s494_s10 = smov 128   ;;  %s495_s14 = smov 8  }
  0xa9   : > { %387 = dma.vmem_to_hbm [thread:$0]  (%p559_p5), %s294_s30, 512, %s296_s5, %s281_s19, %s494_s10, %s494_s10, %s495_s14  }
  0xaa PF: > { %p393_p4 = scmp.ge.s32.totalorder %s492_s18, 2  ;;  %s310_s20 = sand.u32 1, %s480_s15  }
  0xab   : > { %s311_s22 = scalar_lea.sflag [#allocation3], %s310_s20 }
  0xac   : > { %p390_p7 = pnand %p393_p4, %p563_p6 }
  0xae   : > { %p391_p8 = pneg %p390_p7 }
  0xb0   : > { %475 = dma.done.wait (%p391_p8), %s311_s22, 512  }
  0xb1   : > { %477 = vsyncadd (%p391_p8), %s311_s22, 4294966784  ;;  %p14_p9 = scmp.ge.s32.totalorder %s546_s21, 6   ;;  %s628_s15 = smov %s484_s16 }
  0xb2   : > { %s629_s16 = smov %s488_s17  ;;  %s630_s17 = smov %s557_s24 }
  0xb3   : > { %s631_s18 = smov %s546_s21  ;;  %16 = sbr.rel (!%p14_p9) target bundleno = 3 (0x3), region = 73 }
  0xb8   :  { %317 = vsyncpa [#allocation3], 1 }
  0xb9   :  { %319 = vsyncpa [#allocation3 + $0x1], 1 }

// kernel: batch_norm_linear.2
= control target key start
LH: loop header
LB: loop body
LE: loop exit
PB: predicated region body
PF: predicated region fallthrough
CT: control target
= control target key end

     0   :  { %s566_s12 = smov 0   ;;  %s568_s13 = smov 0   ;;  %s648_s0 = inlined_call_operand.vmem [shape: f32[128,32], index: 0, kind: input, shape index: {}]   ;;  %s649_s1 = inlined_call_operand.vmem [shape: bf16[32,64], index: 1, kind: input, shape index: {}]   ;;  %s650_s2 = inlined_call_operand.vmem [shape: f32[16,64], index: 2, kind: output, shape index: {0}]   ;;  %s651_s3 = inlined_call_operand.vmem [shape: f32[16,64], index: 3, kind: output, shape index: {1}]  }
   0x1   :  { %s570_s14 = smov 0   ;;  %s572_s15 = smov 0  }
   0x2   :  { %s574_s16 = smov 0  }
   0x3 LB: > { %s23_s17 = sadd.s32 1, %s535_s14  ;;  %s26_s18 = sadd.s32 1, %s539_s15  ;;  %s543_s16 = sphi %s574_s16, %s14_s16   ;;  %s539_s15 = sphi %s572_s15, %s655_s15   ;;  %s535_s14 = sphi %s570_s14, %s654_s14   ;;  %s531_s13 = sphi %s568_s13, %s653_s13   ;;  %s527_s12 = sphi %s566_s12, %s652_s12  }
   0x4   : > { %p24_p0 = scmp.ge.s32.totalorder %s23_s17, 2  ;;  %p441_p1 = scmp.ge.s32.totalorder %s543_s16, 1 }
   0x5   : > { %p169_p2 = scmp.lt.s32.totalorder %s543_s16, 5 }
   0x6   : > { %s657_s17 = smov (%p24_p0, %s23_s17), 0  ;;  %s659_s18 = smov (!%p24_p0, %s26_s18), %s539_s15 }
   0x7   : > { %p170_p3 = pnand %p441_p1, %p169_p2  ;;  %p28_p4 = scmp.ge.s32.totalorder %s659_s18, 2 }
   0x8   : > { %s442_s19 = sshll.u32 (!%p170_p3), %s531_s13, 1  ;;  %p214_p5 = scmp.lt.s32.totalorder (!%p170_p3), %s531_s13, 1 }
   0x9   : > { %s661_s18 = smov (%p28_p4, %s659_s18), 0  ;;  %173 = sbr.rel (%p170_p3) target bundleno = 189 (0xbd), region = 28 }
   0xa   : > { %s201_s20 = sadd.s32 (!%p170_p3), %s527_s12, %s442_s19  ;;  %p447_p8 = scmp.ne.s32.totalorder (!%p170_p3), %s527_s12, 0 }
   0xb   : > { %p202_p6 = scmp.lt.s32.totalorder (!%p170_p3), %s201_s20, 3 }
   0xe   : > { %s663_s13 = smov (!%p214_p5, %s531_s13), 1  ;;  %s665_s20 = smov (!%p202_p6, %s201_s20), 3 }
   0xf   : > { %s445_s21 = sshll.u32 %s663_s13, 3  ;;  %s443_s22 = sshll.u32 %s665_s20, 2 }
  0x10   : > { %s602_s25 = scalar_lea.vmem %s650_s2, %s445_s21  ;;  %p205_p7 = scmp.lt.s32.totalorder %s443_s22, 15 }
  0x11   : > { %s607_s28 = scalar_lea.vmem %s651_s3, %s445_s21  ;;  %226 = sbr.rel (%p447_p8) target bundleno = 25 (0x19), region = 32 }
  0x12   : > { %s667_s22 = smov (!%p205_p7, %s443_s22), 15 }
  0x13   : > { %s444_s29 = sshll.u32 %s667_s22, 3 }
  0x14   : > { %s208_s5 = scalar_lea.vmem %s648_s0, %s444_s29 }
  0x16   : > { %vm227_vm0 = vcmask 523264   ;;  %v545_v0 = vmov 0.0  }
  0x17   : > { %228 = vst.msk [vmem:[%s602_s25] sm:$0xff] %vm227_vm0, %v545_v0 }
  0x18   : > { %229 = vst.msk [vmem:[%s607_s28] sm:$0xff] %vm227_vm0, %v545_v0 }
  0x19 PF: > { %v463_v1 = vld [vmem:[%s649_s1 + $0x8] sm:$0xff]  ;;  %v462_v2 = vld [vmem:[%s649_s1] sm:$0xff]  ;;  %v457_v5 = vld [vmem:[%s208_s5 + $0x10] sm:$0xff]  ;;  %vm249_vm1 = vcmask 261120   ;;  %vm267_vm2 = vcmask 523264   ;;  %vm335_vm3 = vcmask 516096  }
  0x1a   : > { %v234_v3 = vld [vmem:[%s208_s5] sm:$0xff]  ;;  %259 = vmatpush.bf16.msra.mxu0 %v463_v1  ;;  %303 = vmatpush.bf16.msra.mxu1 %v463_v1  ;;  %v235_v4 = vld [vmem:[%s208_s5 + $0x8] sm:$0xff]  ;;  %v458_v6 = vld [vmem:[%s208_s5 + $0x18] sm:$0xff] }
  0x1b   : > { %v236_v7 = vpack.c.bf16 %v235_v4, %v234_v3  ;;  %v293_v8 = vpack.c.bf16 %v458_v6, %v457_v5 }
  0x1e   : > { %260 = vmatpush.bf16.msra.mxu0 %v462_v2  ;;  %304 = vmatpush.bf16.msra.mxu1 %v462_v2  ;;  %v333_v51 = vld [vmem:[%s602_s25] sm:$0x1] }
  0x1f   : > { %v337_v55 = vld [vmem:[%s607_s28] sm:$0x1] }
  0x21   : > { %456 = vmatmul.msk.bf16.vlgmr.msra.gmra.mxu0 %vm249_vm1, %v236_v7  ;;  %459 = vmatmul.msk.bf16.vlgmr.msra.gmra.mxu1 %vm249_vm1, %v293_v8 }
  0x9e   : > { %v262_v9 = vpop.f32.mrf.mxu0  ;;  %v306_v10 = vpop.f32.mrf.mxu1 }
  0x9f   : > { %v278_v11 = vmul.f32 %v262_v9, %v262_v9  ;;  %v321_v12 = vmul.f32 %v306_v10, %v306_v10  ;;  %v268_v13 = vsel %vm267_vm2, %v262_v9, 0.0  ;;  %v311_v14 = vsel %vm267_vm2, %v306_v10, 0.0 }
  0xa1   : > { %v280_v23 = vsel %vm267_vm2, %v278_v11, 0.0  ;;  %v323_v24 = vsel %vm267_vm2, %v321_v12, 0.0 }
  0xa6   : > { %v264_v15 = vpop.f32.mrf.mxu0  ;;  %v308_v16 = vpop.f32.mrf.mxu1 }
  0xa7   : > { %v269_v17 = vsel %vm267_vm2, %v264_v15, 0.0  ;;  %v279_v18 = vmul.f32 %v264_v15, %v264_v15  ;;  %v312_v19 = vsel %vm267_vm2, %v308_v16, 0.0  ;;  %v322_v20 = vmul.f32 %v308_v16, %v308_v16 }
  0xa8   : > { %v270_v21 = vadd.f32 %v269_v17, %v268_v13  ;;  %v313_v22 = vadd.f32 %v312_v19, %v311_v14 }
  0xa9   : > { %v281_v25 = vsel %vm267_vm2, %v279_v18, 0.0  ;;  %v324_v26 = vsel %vm267_vm2, %v322_v20, 0.0 }
  0xaa   : > { %v271_v27 = vrot.slane %v270_v21, 4  ;;  %v282_v28 = vadd.f32 %v281_v25, %v280_v23  ;;  %v314_v29 = vrot.slane %v313_v22, 4  ;;  %v325_v30 = vadd.f32 %v324_v26, %v323_v24 }
  0xac   : > { %v272_v31 = vadd.f32 %v271_v27, %v270_v21  ;;  %v283_v32 = vrot.slane %v282_v28, 4  ;;  %v315_v33 = vadd.f32 %v314_v29, %v313_v22  ;;  %v326_v34 = vrot.slane %v325_v30, 4 }
  0xae   : > { %v273_v35 = vrot.slane %v272_v31, 2  ;;  %v284_v36 = vadd.f32 %v283_v32, %v282_v28  ;;  %v316_v37 = vrot.slane %v315_v33, 2  ;;  %v327_v38 = vadd.f32 %v326_v34, %v325_v30 }
  0xb0   : > { %v274_v39 = vadd.f32 %v273_v35, %v272_v31  ;;  %v285_v40 = vrot.slane %v284_v36, 2  ;;  %v317_v41 = vadd.f32 %v316_v37, %v315_v33  ;;  %v328_v42 = vrot.slane %v327_v38, 2 }
  0xb2   : > { %v275_v43 = vrot.slane %v274_v39, 1  ;;  %v286_v44 = vadd.f32 %v285_v40, %v284_v36  ;;  %v318_v45 = vrot.slane %v317_v41, 1  ;;  %v329_v46 = vadd.f32 %v328_v42, %v327_v38 }
  0xb4   : > { %v276_v47 = vadd.f32 %v275_v43, %v274_v39  ;;  %v287_v48 = vrot.slane %v286_v44, 1  ;;  %v319_v49 = vadd.f32 %v318_v45, %v317_v41  ;;  %v330_v50 = vrot.slane %v329_v46, 1 }
  0xb6   : > { %v288_v52 = vadd.f32 %v287_v48, %v286_v44  ;;  %v320_v53 = vadd.f32 %v319_v49, %v276_v47  ;;  %v331_v54 = vadd.f32 %v330_v50, %v329_v46 }
  0xb8   : > { %v332_v56 = vadd.f32 %v331_v54, %v288_v52  ;;  %v334_v57 = vadd.f32 %v333_v51, %v320_v53 }
  0xba   : > { %336 = vst.msk [vmem:[%s602_s25] sm:$0x1] %vm335_vm3, %v334_v57  ;;  %v338_v58 = vadd.f32 %v337_v55, %v332_v56 }
  0xbc   : > { %339 = vst.msk [vmem:[%s607_s28] sm:$0x1] %vm335_vm3, %v338_v58 }
  0xbd PF: > { %s14_s16 = sadd.s32 1, %s543_s16   ;;  %s652_s12 = smov %s535_s14 }
  0xbe   : > { %p11_p9 = scmp.ge.s32.totalorder %s14_s16, 6   ;;  %s653_s13 = smov %s539_s15 }
  0xbf   : > { %s654_s14 = smov %s657_s17  ;;  %s655_s15 = smov %s661_s18 }
  0xc0   :  { %13 = sbr.rel (!%p11_p9) target bundleno = 3 (0x3), region = 75 }

</bundles_post_ra>
